<compile_context>
chip_gen: v6e
topology: v6e:2x2x1
jax: 0.10.0
libtpu: 0.0.40
codegen_flags: <defaults>
</compile_context>

<pallas_src>
import functools
import math

import jax
import jax.numpy as jnp
from jax.experimental import pallas as pl
from jax.experimental.pallas import tpu as pltpu


# ----------------------------- layout / tiling helpers -----------------------

def _vmem_capacity_bytes():
    """Physical VMEM of this TPU generation (fallback: 128 MiB, v5e/v6e)."""
    try:
        return int(pltpu.get_tpu_info().vmem_capacity_bytes)
    except Exception:   # non-TPU / interpret fallback
        return 128 * 1024 * 1024


def _fold_last_dims(S, C, max_lanes=4096):
    """Exact (S, C) -> (S_eff, C_eff) fold (S_eff*C_eff == S*C) for lane density.

    Only used when the activation is elementwise (act is None or 'sigmoid');
    softmax must keep the true class axis.
    """
    if C % 128 == 0:
        return S, C
    for f in range(1, S + 1):
        if S % f == 0 and (f * C) % 128 == 0 and f * C <= max_lanes:
            return S // f, f * C
    best = 1
    for f in range(1, S + 1):
        if S % f == 0 and f * C <= 1024:
            best = f
    return S // best, best * C


def _pick_block_rows(S_eff, C_eff, itemsize, vmem_cap):
    """Rows per input block, budgeted against this generation's VMEM.

    Working set per block row:
      inputs : 2 tensors x 2 pipeline buffers x itemsize
      temps  : ~4 live f32 intermediates (p1, p2, log terms, loss)
    Prefers an exact divisor of S_eff (multiple of 8) so the last tile is never
    ragged and the in-kernel mask is compiled out.
    """
    usable = min(vmem_cap // 2, 80 << 20)            # v5e/v6e ~64 MiB, v7x ~32 MiB
    bytes_per_row = C_eff * (4 * itemsize + 4 * 4)
    max_rows = max(8, int(usable // max(1, bytes_per_row)))
    if S_eff <= max_rows:
        return S_eff
    cap = (max_rows // 8) * 8
    for r in range(cap, 7, -8):                      # largest 8-multiple divisor
        if S_eff % r == 0:
            return r
    return cap                                       # ragged last tile (masked)


# ------------------------------ in-kernel helpers -----------------------------

def _activate(x, act, want_log):
    """Return (p, logp) with p matching `act(x) + 1e-10` from the reference and
    logp ~= log(p) (None when want_log=False).  EUP-minimal forms:
      softmax -> one exp/elem + one log/row (fused log-softmax)
      sigmoid -> one tanh/elem (+ one log/elem if want_log)
      None    -> identity      (+ one log/elem if want_log)
    """
    if act == "softmax":
        m = jnp.max(x, axis=-1, keepdims=True)
        sh = x - m
        e = jnp.exp(sh)
        z = jnp.sum(e, axis=-1, keepdims=True)
        p = e * (1.0 / z) + 1e-10                    # one exact divide per row
        if not want_log:
            return p, None
        # log-softmax; floor at log(1e-10) to match log(softmax + 1e-10) when a
        # class fully underflows (avoids -inf / NaN in the (p2-p1)*(lp2-lp1) form).
        logp = jnp.maximum(sh - jnp.log(z), -23.025851)
        return p, logp
    if act == "sigmoid":
        p = 0.5 * jnp.tanh(0.5 * x) + 0.5            # single EUP op
        p = p + 1e-10
        return (p, jnp.log(p)) if want_log else (p, None)
    # act is None: raw inputs.  log(x + 1e-10) is NaN for x < 0, matching the
    # reference's torch.log on non-positive inputs.
    return (x, jnp.log(x + 1e-10)) if want_log else (x, None)


# --------------------------------- Pallas kernel ------------------------------

def _dml_kernel(o1_ref, o2_ref, out_ref, acc_ref, *,
                act, use_log, valid_last, needs_mask, scale, acc_rows):
    c = pl.program_id(1)            # split chunk (megacore balance)
    s = pl.program_id(2)            # S-tile within chunk (reduction axis)
    n_c = pl.num_programs(1)
    n_s = pl.num_programs(2)

    @pl.when(s == 0)
    def _init():
        acc_ref[...] = jnp.zeros_like(acc_ref)

    x1 = o1_ref[...].astype(jnp.float32)        # (1, tS, C_eff)
    x2 = o2_ref[...].astype(jnp.float32)

    if use_log:
        # 2-log form of the reference's symmetric term:
        #   p2*(log(p2+e) - log p1) + p1*(log(p1+e) - log p2)  ~=  (p2-p1)*(lp2-lp1)
        p1, lp1 = _activate(x1, act, want_log=True)
        p2, lp2 = _activate(x2, act, want_log=True)
        loss = (p2 - p1) * (lp2 - lp1)
    else:
        # KLJSLoss(mode='kl'): (p2-p1)*(log(p2+e)-log(p1+e)), e=1e-5; the outer
        # '+eps' inside the reference's log is dropped (<= ~eps/elem shift).
        p1, _ = _activate(x1, act, want_log=False)
        p2, _ = _activate(x2, act, want_log=False)
        eps = 1e-5
        loss = (p2 - p1) * (jnp.log(p2 + eps) - jnp.log(p1 + eps))

    def _accum(v):
        # Deferred sublane collapse: per block only VPU vreg adds; the
        # cross-sublane + cross-lane reduce happens once in _finalize.
        blk = v.shape[1]
        part = jnp.sum(v.reshape(1, blk // acc_rows, acc_rows, v.shape[2]), axis=1)
        acc_ref[...] += part

    if needs_mask:
        # Only the globally-last S tile is ragged: keep iota/compare/select off
        # the hot path for every other block (pl.when cold path skipped at runtime).
        is_last = jnp.logical_and(c == n_c - 1, s == n_s - 1)

        @pl.when(jnp.logical_not(is_last))
        def _accum_full():
            _accum(loss)

        @pl.when(is_last)
        def _accum_masked():
            row = jax.lax.broadcasted_iota(jnp.int32, loss.shape, 1)
            _accum(jnp.where(row < valid_last, loss, 0.0))
    else:
        _accum(loss)

    @pl.when(s == n_s - 1)
    def _finalize():
        out_ref[...] = jnp.sum(acc_ref[...], axis=(1, 2), keepdims=True) * scale


# ----------------------------------- wrapper -----------------------------------

def _dml_pallas(out1, out2, *, act, use_log, block_rows=None):
    """Returns the per-batch sum-of-loss (already scaled): shape (B,) float32."""
    B, S, C = out1.shape
    if act == "softmax":
        S_eff, C_eff = S, C
        x1, x2 = out1, out2
    else:
        S_eff, C_eff = _fold_last_dims(S, C)
        x1 = out1.reshape(B, S_eff, C_eff)
        x2 = out2.reshape(B, S_eff, C_eff)

    itemsize = jnp.dtype(out1.dtype).itemsize
    vmem_cap = _vmem_capacity_bytes()
    if block_rows is None:
        t_s = _pick_block_rows(S_eff, C_eff, itemsize, vmem_cap)
    else:
        assert block_rows == S_eff or block_rows % 8 == 0
        t_s = block_rows

    grid_s = pl.cdiv(S_eff, t_s)
    valid_last = S_eff - (grid_s - 1) * t_s
    needs_mask = valid_last != t_s

    # v7x megacore: with B == 1 (or odd B) one TensorCore would idle / imbalance;
    # split the S reduction into 2 independent 'parallel' chunks when possible.
    n_split = 2 if (B % 2 == 1 and grid_s % 2 == 0) else 1
    s_per = grid_s // n_split

    scale = 1.0 if use_log else 0.5 / (S * C)
    acc_rows = math.gcd(t_s, 8)

    kernel = functools.partial(
        _dml_kernel, act=act, use_log=use_log, valid_last=valid_last,
        needs_mask=needs_mask, scale=scale, acc_rows=acc_rows)

    if act == "softmax":
        n_trans = 2 if use_log else 4       # exp/elem/tensor (+ log/elem in KL mode)
    elif act == "sigmoid":
        n_trans = 4                         # tanh + log per elem per tensor
    else:
        n_trans = 2                         # log per elem per tensor
    cost = pl.CostEstimate(
        flops=10 * B * S * C,
        transcendentals=n_trans * B * S * C,
        bytes_accessed=2 * B * S * C * itemsize + B * n_split * 4)

    vmem_limit = max(32 << 20, min(vmem_cap - (16 << 20), 96 << 20))

    in_map = lambda b, c, s: (b, c * s_per + s, 0)
    out_map = lambda b, c, s: (b * n_split + c, 0, 0)

    parts = pl.pallas_call(
        kernel,
        out_shape=jax.ShapeDtypeStruct((B * n_split, 1, 1), jnp.float32),
        grid_spec=pltpu.PrefetchScalarGridSpec(
            num_scalar_prefetch=0,
            grid=(B, n_split, s_per),
            in_specs=[pl.BlockSpec((1, t_s, C_eff), in_map),
                      pl.BlockSpec((1, t_s, C_eff), in_map)],
            out_specs=pl.BlockSpec((1, 1, 1), out_map),
            scratch_shapes=[pltpu.VMEM((1, acc_rows, C_eff), jnp.float32)]),
        compiler_params=pltpu.CompilerParams(
            dimension_semantics=("parallel", "parallel", "arbitrary"),
            vmem_limit_bytes=vmem_limit),
        cost_estimate=cost,
    )(x1, x2)                               # (B * n_split, 1, 1)

    return jnp.sum(parts.reshape(B, n_split), axis=1)


class DMLLoss:
    """JAX/Pallas port of the PyTorch DMLLoss module (forward only; no params)."""

    def __init__(self, act=None, use_log=False):
        if act is not None:
            assert act in ("softmax", "sigmoid")
        self.act = act
        self.use_log = use_log

    def __call__(self, out1, out2, *, block_rows=None):
        assert out1.shape == out2.shape and out1.ndim == 3
        B = out1.shape[0]
        per_batch = _dml_pallas(out1, out2, act=self.act, use_log=self.use_log,
                                block_rows=block_rows)        # (B,)
        if self.use_log:
            # (kldiv(log p1, p2) + kldiv(log p2, p1)) / 2 == total_sum / (2 * B)
            return jnp.sum(per_batch) * (0.5 / B)
        return per_batch                 # (B,), == torch.mean(loss, axis=[1, 2])


# ------------------------------ plain-JAX reference ----------------------------

def _reference_dml(out1, out2, act=None, use_log=False):
    o1 = out1.astype(jnp.float32)
    o2 = out2.astype(jnp.float32)
    if act == "softmax":
        o1 = jax.nn.softmax(o1, axis=-1) + 1e-10
        o2 = jax.nn.softmax(o2, axis=-1) + 1e-10
    elif act == "sigmoid":
        o1 = jax.nn.sigmoid(o1) + 1e-10
        o2 = jax.nn.sigmoid(o2) + 1e-10
    if use_log:
        eps = 1e-10
        log1, log2 = jnp.log(o1), jnp.log(o2)
        kld = lambda x, t: jnp.sum(t * (jnp.log(t + eps) - x)) / t.shape[0]
        return (kld(log1, o2) + kld(log2, o1)) / 2.0
    eps = 1e-5
    loss = o2 * jnp.log((o2 + eps) / (o1 + eps) + eps)
    loss = loss + o1 * jnp.log((o1 + eps) / (o2 + eps) + eps)
    loss = loss * 0.5
    return jnp.mean(loss, axis=(1, 2))


# ----------------------------------- demo --------------------------------------

if __name__ == "__main__":
    key = jax.random.PRNGKey(0)
    k1, k2, k3, k4, k5, k6 = jax.random.split(key, 6)

    # 1) Default config: DMLLoss(act=None, use_log=False) -> KL mode, mean over (1, 2).
    B, S, C = 2, 8, 32
    out1 = jax.random.uniform(k1, (B, S, C), dtype=jnp.float32)
    out2 = jax.random.uniform(k2, (B, S, C), dtype=jnp.float32)
    loss = jax.block_until_ready(DMLLoss()(out1, out2))
    ref = _reference_dml(out1, out2)
    assert loss.shape == (B,)
    assert jnp.allclose(loss, ref, atol=1e-4, rtol=1e-4), (loss, ref)

    # 2) act='softmax', use_log=True -> scalar (fused log-softmax path).
    loss2 = jax.block_until_ready(DMLLoss(act="softmax", use_log=True)(out1, out2))
    ref2 = _reference_dml(out1, out2, act="softmax", use_log=True)
    assert jnp.allclose(loss2, ref2, atol=1e-4, rtol=1e-4), (loss2, ref2)

    # 3) Multi-tile accumulation + ragged last tile (forced small S-tile):
    #    exercises the last-tile-only mask path.
    B3, S3, C3 = 2, 20, 160
    a3 = jax.random.uniform(k3, (B3, S3, C3), dtype=jnp.float32)
    b3 = jax.random.uniform(k4, (B3, S3, C3), dtype=jnp.float32)
    loss3 = jax.block_until_ready(DMLLoss(act="softmax")(a3, b3, block_rows=8))
    ref3 = _reference_dml(a3, b3, act="softmax")
    assert jnp.allclose(loss3, ref3, atol=1e-4, rtol=1e-4), (loss3, ref3)

    # 4) bf16 inputs stay bf16 in HBM; kernel upcasts to f32 in VMEM.
    loss4 = jax.block_until_ready(
        DMLLoss()(out1.astype(jnp.bfloat16), out2.astype(jnp.bfloat16)))
    ref4 = _reference_dml(out1.astype(jnp.bfloat16), out2.astype(jnp.bfloat16))
    assert jnp.allclose(loss4, ref4, atol=2e-2, rtol=2e-2), (loss4, ref4)

    # 5) B=1 exercises the megacore S-split, tanh-sigmoid and 2-log use_log path.
    B5, S5, C5 = 1, 32, 128
    a5 = jax.random.uniform(k5, (B5, S5, C5), dtype=jnp.float32)
    b5 = jax.random.uniform(k6, (B5, S5, C5), dtype=jnp.float32)
    loss5 = jax.block_until_ready(
        DMLLoss(act="sigmoid", use_log=True)(a5, b5, block_rows=8))
    ref5 = _reference_dml(a5, b5, act="sigmoid", use_log=True)
    assert jnp.allclose(loss5, ref5, atol=1e-4, rtol=1e-4), (loss5, ref5)

    print("KERNEL_OK")
</pallas_src>

<mosaic_0001>
module attributes {stable_mosaic.version = 11 : i64} {
  func.func @_dml_kernel(%arg0: i32, %arg1: i32, %arg2: i32, %arg3: memref<1x2x128xf32, #tpu.memory_space<vmem>>, %arg4: memref<1x2x128xf32, #tpu.memory_space<vmem>>, %arg5: memref<1x1x1xf32, #tpu.memory_space<vmem>>, %arg6: memref<1x2x128xf32, #tpu.memory_space<vmem>>) attributes {dimension_semantics = [#tpu.dimension_semantics<parallel>, #tpu.dimension_semantics<parallel>, #tpu.dimension_semantics<arbitrary>], iteration_bounds = array<i64: 2, 1, 1>, scalar_prefetch = 0 : i64, scratch_operands = 1 : i64, tpu.core_type = #tpu.core_type<tc>, window_params = [{transform_indices = @transform_0, window_bounds = array<i64: 1, 2, 128>}, {transform_indices = @transform_1, window_bounds = array<i64: 1, 2, 128>}, {transform_indices = @transform_2, window_bounds = array<i64: 1, 1, 1>}]} {
    %c0_i32 = arith.constant 0 : i32
    %0 = arith.cmpi eq, %arg2, %c0_i32 : i32
    %1 = arith.extui %0 : i1 to i32
    %c0_i32_0 = arith.constant 0 : i32
    %2 = arith.cmpi ne, %1, %c0_i32_0 : i32
    scf.if %2 {
      %cst_16 = arith.constant 0.000000e+00 : f32
      %22 = vector.broadcast %cst_16 : f32 to vector<1x2x128xf32>
      %c0_17 = arith.constant 0 : index
      %c0_18 = arith.constant 0 : index
      %c0_19 = arith.constant 0 : index
      %23 = vector.load %arg6[%c0_17, %c0_18, %c0_19] : memref<1x2x128xf32, #tpu.memory_space<vmem>>, vector<1x2x128xf32>
      tpu.vector_store %arg6[%c0_17, %c0_18, %c0_19], %22 {strides = array<i32>} : memref<1x2x128xf32, #tpu.memory_space<vmem>>, vector<1x2x128xf32>,
    } else {
    }
    %c0 = arith.constant 0 : index
    %c0_1 = arith.constant 0 : index
    %c0_2 = arith.constant 0 : index
    %3 = vector.load %arg3[%c0, %c0_1, %c0_2] : memref<1x2x128xf32, #tpu.memory_space<vmem>>, vector<1x2x128xf32>
    %c0_3 = arith.constant 0 : index
    %c0_4 = arith.constant 0 : index
    %c0_5 = arith.constant 0 : index
    %4 = vector.load %arg4[%c0_3, %c0_4, %c0_5] : memref<1x2x128xf32, #tpu.memory_space<vmem>>, vector<1x2x128xf32>
    %5 = arith.subf %4, %3 : vector<1x2x128xf32>
    %cst = arith.constant 9.99999974E-6 : f32
    %6 = vector.broadcast %cst : f32 to vector<1x2x128xf32>
    %7 = arith.addf %4, %6 : vector<1x2x128xf32>
    %8 = math.log %7 : vector<1x2x128xf32>
    %cst_6 = arith.constant 9.99999974E-6 : f32
    %9 = vector.broadcast %cst_6 : f32 to vector<1x2x128xf32>
    %10 = arith.addf %3, %9 : vector<1x2x128xf32>
    %11 = math.log %10 : vector<1x2x128xf32>
    %12 = arith.subf %8, %11 : vector<1x2x128xf32>
    %13 = arith.mulf %5, %12 : vector<1x2x128xf32>
    %14 = vector.shape_cast %13 : vector<1x2x128xf32> to vector<1x1x2x128xf32>
    %cst_7 = arith.constant dense<0.000000e+00> : vector<1x2x128xf32>
    %15 = vector.multi_reduction <add>, %14, %cst_7 [1] : vector<1x1x2x128xf32> to vector<1x2x128xf32>
    %c0_8 = arith.constant 0 : index
    %c0_9 = arith.constant 0 : index
    %c0_10 = arith.constant 0 : index
    %16 = vector.load %arg6[%c0_8, %c0_9, %c0_10] : memref<1x2x128xf32, #tpu.memory_space<vmem>>, vector<1x2x128xf32>
    %17 = arith.addf %16, %15 : vector<1x2x128xf32>
    %c0_11 = arith.constant 0 : index
    %c0_12 = arith.constant 0 : index
    %c0_13 = arith.constant 0 : index
    %18 = vector.load %arg6[%c0_11, %c0_12, %c0_13] : memref<1x2x128xf32, #tpu.memory_space<vmem>>, vector<1x2x128xf32>
    tpu.vector_store %arg6[%c0_11, %c0_12, %c0_13], %17 {strides = array<i32>} : memref<1x2x128xf32, #tpu.memory_space<vmem>>, vector<1x2x128xf32>,
    %c0_i32_14 = arith.constant 0 : i32
    %19 = arith.cmpi eq, %arg2, %c0_i32_14 : i32
    %20 = arith.extui %19 : i1 to i32
    %c0_i32_15 = arith.constant 0 : i32
    %21 = arith.cmpi ne, %20, %c0_i32_15 : i32
    scf.if %21 {
      %c0_16 = arith.constant 0 : index
      %c0_17 = arith.constant 0 : index
      %c0_18 = arith.constant 0 : index
      %22 = vector.load %arg6[%c0_16, %c0_17, %c0_18] : memref<1x2x128xf32, #tpu.memory_space<vmem>>, vector<1x2x128xf32>
      %cst_19 = arith.constant dense<0.000000e+00> : vector<1xf32>
      %23 = vector.multi_reduction <add>, %22, %cst_19 [1, 2] : vector<1x2x128xf32> to vector<1xf32>
      %24 = vector.shape_cast %23 : vector<1xf32> to vector<1x1x1xf32>
      %cst_20 = arith.constant 0.001953125 : f32
      %25 = vector.broadcast %cst_20 : f32 to vector<1x1x1xf32>
      %26 = arith.mulf %24, %25 : vector<1x1x1xf32>
      %c0_21 = arith.constant 0 : index
      %c0_22 = arith.constant 0 : index
      %c0_23 = arith.constant 0 : index
      %27 = vector.load %arg5[%c0_21, %c0_22, %c0_23] : memref<1x1x1xf32, #tpu.memory_space<vmem>>, vector<1x1x1xf32>
      tpu.vector_store %arg5[%c0_21, %c0_22, %c0_23], %26 {strides = array<i32>} : memref<1x1x1xf32, #tpu.memory_space<vmem>>, vector<1x1x1xf32>,
    } else {
    }
    return
  }
  func.func @transform_0(%arg0: i32, %arg1: i32, %arg2: i32) -> (i32, i32, i32) {
    %c1_i32 = arith.constant 1 : i32
    %0 = arith.muli %arg1, %c1_i32 : i32
    %1 = arith.addi %0, %arg2 : i32
    %c0_i32 = arith.constant 0 : i32
    %c0_i32_0 = arith.constant 0 : i32
    return %arg0, %1, %c0_i32 : i32, i32, i32
  }
  func.func @transform_1(%arg0: i32, %arg1: i32, %arg2: i32) -> (i32, i32, i32) {
    %c1_i32 = arith.constant 1 : i32
    %0 = arith.muli %arg1, %c1_i32 : i32
    %1 = arith.addi %0, %arg2 : i32
    %c0_i32 = arith.constant 0 : i32
    %c0_i32_0 = arith.constant 0 : i32
    return %arg0, %1, %c0_i32 : i32, i32, i32
  }
  func.func @transform_2(%arg0: i32, %arg1: i32, %arg2: i32) -> (i32, i32, i32) {
    %c1_i32 = arith.constant 1 : i32
    %0 = arith.muli %arg0, %c1_i32 : i32
    %1 = arith.addi %0, %arg1 : i32
    %c0_i32 = arith.constant 0 : i32
    %c0_i32_0 = arith.constant 0 : i32
    %c0_i32_1 = arith.constant 0 : i32
    return %1, %c0_i32, %c0_i32_0 : i32, i32, i32
  }
}

</mosaic_0001>

<bundles_post_ra>
// kernel: tpu_custom_call.1
= control target key start
LH: loop header
LB: loop body
LE: loop exit
PB: predicated region body
PF: predicated region fallthrough
CT: control target
= control target key end

     0   :  { %7 = vsyncpa [#allocation4], 0  ;;  %s703_s0 = inlined_call_operand.hbm [shape: f32[2,2,128], index: 0, kind: input, shape index: {}]   ;;  %s704_s1 = inlined_call_operand.hbm [shape: f32[2,2,128], index: 1, kind: input, shape index: {}]   ;;  %s705_s2 = inlined_call_operand.vmem [shape: f32[2,1,1], index: 2, kind: output, shape index: {}]  }
   0x1   :  { %9 = vsyncpa [#allocation4 + $0x1], 0 }
   0x2   :  { %10 = vsyncpa [#allocation6], 0 }
   0x3   :  { %12 = vsyncpa [#allocation6 + $0x1], 0  ;;  %s577_s9 = smov 0   ;;  %s579_s10 = smov 0  }
   0x4   :  { %s581_s11 = smov 0   ;;  %s583_s12 = smov 0  }
   0x5   :  { %s585_s13 = smov 0   ;;  %s587_s14 = smov 0  }
   0x6 LB: > { %s369_s15 = sadd.s32 4294967295, %s557_s14   ;;  %s37_s16 = sadd.s32 1, %s553_s13  ;;  %s557_s14 = sphi %s587_s14, %s18_s14   ;;  %s553_s13 = sphi %s585_s13, %s714_s13   ;;  %s549_s12 = sphi %s583_s12, %s713_s12   ;;  %s545_s11 = sphi %s581_s11, %s712_s11   ;;  %s541_s10 = sphi %s579_s10, %s711_s10   ;;  %s537_s9 = sphi %s577_s9, %s710_s9  }
   0x7   : > { %p39_p0 = scmp.ge.s32.totalorder %s37_s16, 2  ;;  %s48_s17 = sadd.s32 1, %s545_s11 }
   0x8   : > { %p55_p1 = scmp.ne.s32.totalorder %s545_s11, %s541_s10  ;;  %p56_p2 = scmp.eq.s32.totalorder %s557_s14, 0 }
   0x9   : > { %s716_s16 = smov (%p39_p0, %s37_s16), 0  ;;  %p61_p4 = scmp.ne.s32.totalorder %s541_s10, %s537_s9 }
   0xa   : > { %p613_p3 = por %p56_p2, %p55_p1  ;;  %s43_s19 = ssub.s32 %s553_s13, %s716_s16 }
   0xb   : > { %p62_p5 = scmp.eq.s32.totalorder %s369_s15, 0  ;;  %p46_p6 = scmp.eq.s32.totalorder %s43_s19, 0 }
   0xc   : > { %p393_p8 = scmp.lt.s32.totalorder %s557_s14, 2  ;;  %s629_s22 = sand.u32 1, %s545_s11  }
   0xd   : > { %p620_p7 = por %p62_p5, %p61_p4  ;;  %s374_s23 = sshll.u32 %s553_s13, 5 }
   0xe   : > { %s626_s21 = scalar_select %p46_p6, %s545_s11, %s48_s17  }
   0xf   : > { %s373_s24 = sshll.u32 %s629_s22, 1  ;;  %s154_s27 = scalar_lea.hbm %s703_s0, %s374_s23 }
  0x10   : > { %s147_s28 = scalar_lea.vmem [#allocation3], %s373_s24  ;;  %p638_p9 = pnand %p393_p8, %p613_p3 }
  0x11   : > { %s156_s29 = sshll.u32 %s147_s28, 4  ;;  %p377_p10 = scmp.ge.s32.totalorder %s557_s14, 1  ;;  %s157_s29 = int_to_ptr.vmem [resolvable:$true] %s156_s29 }
  0x12   : > { %p181_p11 = scmp.lt.s32.totalorder %s557_s14, 3  ;;  %s144_s3 = scalar_lea.sflag [#allocation4], %s629_s22 }
  0x13   : > { %p449_p12 = pneg %p638_p9  ;;  %s460_s4 = scalar_lea.vmem %s157_s29, 32 }
  0x14   : > { %p461_p13 = scmp.ne.s32.totalorder %s157_s29, %s460_s4  ;;  %s559_s5 = smov [#allocation3]  }
  0x15   : > { %s465_s6 = sshll.u32 %s559_s5, 4  ;;  %s466_s6 = int_to_ptr.vmem [resolvable:$false] %s465_s6 }
  0x16   : > { %p463_p0 = pnand %p461_p13, %p449_p12  ;;  %s467_s7 = scalar_lea.vmem %s466_s6, 64 }
  0x17   : > { %p468_p2 = scmp.lt.s32.totalorder %s157_s29, %s466_s6  ;;  %p469_p3 = scmp.lt.s32.totalorder %s467_s7, %s460_s4 }
  0x18   : > { %p464_p1 = pneg %p463_p0 }
  0x19   : > { %p470_p4 = por %p469_p3, %p468_p2 }
  0x1b   : > { %p471_p5 = pnand %p470_p4, %p464_p1 }
  0x1d   : > { %474 = shalt.err (!%p471_p5)
}
  0x1e   : > { %389 = dma.hbm_to_vmem [thread:$0]  (!%p638_p9), %s154_s27, 32, %s157_s29, %s144_s3  }
  0x1f   : > { %p656_p6 = pnand %p377_p10, %p181_p11  ;;  %s174_s17 = scalar_lea.hbm %s704_s1, %s374_s23 }
  0x20   : > { %s167_s18 = scalar_lea.vmem [#allocation5], %s373_s24  ;;  %s164_s25 = scalar_lea.sflag [#allocation6], %s629_s22 }
  0x21   : > { %s176_s19 = sshll.u32 %s167_s18, 4  ;;  %s560_s27 = smov [#allocation5]   ;;  %s177_s19 = int_to_ptr.vmem [resolvable:$true] %s176_s19 }
  0x22   : > { %s488_s26 = scalar_lea.vmem %s177_s19, 32  ;;  %s493_s28 = sshll.u32 %s560_s27, 4  ;;  %s494_s28 = int_to_ptr.vmem [resolvable:$false] %s493_s28 }
  0x23   : > { %p489_p8 = scmp.ne.s32.totalorder %s177_s19, %s488_s26  ;;  %s495_s29 = scalar_lea.vmem %s494_s28, 64 }
  0x24   : > { %p496_p10 = scmp.lt.s32.totalorder %s177_s19, %s494_s28  ;;  %p497_p11 = scmp.lt.s32.totalorder %s495_s29, %s488_s26 }
  0x25   : > { %p491_p13 = pnand %p489_p8, %p449_p12 }
  0x26   : > { %p498_p1 = por %p497_p11, %p496_p10 }
  0x27   : > { %p492_p0 = pneg %p491_p13 }
  0x29   : > { %p499_p2 = pnand %p498_p1, %p492_p0 }
  0x2b   : > { %502 = shalt.err (!%p499_p2)
}
  0x2c   : > { %392 = dma.hbm_to_vmem [thread:$0]  (!%p638_p9), %s174_s17, 32, %s177_s19, %s164_s25  }
  0x2d   : > { %185 = sbr.rel (%p656_p6) target bundleno = 241 (0xf1), region = 28  ;;  %s187_s22 = sand.u32 (!%p656_p6), 1, %s541_s10  }
  0x2e   : > { %s378_s23 = sshll.u32 (!%p656_p6), %s187_s22, 1  ;;  %s188_s24 = scalar_lea.sflag (!%p656_p6), [#allocation4], %s187_s22 }
  0x2f   : > { %s191_s3 = scalar_lea.vmem (!%p656_p6), [#allocation3], %s378_s23 }
  0x32   : > { %528 = dma.done.wait (%p620_p7), %s188_s24, 32  }
  0x33   : > { %530 = vsyncadd (%p620_p7), %s188_s24, 4294967264  ;;  %s197_s4 = scalar_lea.sflag [#allocation6], %s187_s22  ;;  %s200_s5 = scalar_lea.vmem [#allocation5], %s378_s23 }
  0x34   : > { %532 = dma.done.wait (%p620_p7), %s197_s4, 32  }
  0x35   : > { %534 = vsyncadd (%p620_p7), %s197_s4, 4294967264  ;;  %v561_v0 = vmov 0.0   ;;  %v237_v1 = vld [vmem:[%s191_s3] sm:$0x3]  ;;  %v238_v2 = vld [vmem:[%s200_s5] sm:$0x3] }
  0x36   : > { %236 = vst [vmem:[#allocation2] sm:$0x3] %v561_v0  ;;  %v240_v3 = vadd.f32 1e-05, %v238_v2  ;;  %v243_v4 = vadd.f32 1e-05, %v237_v1  ;;  %v239_v8 = vsub.f32 %v238_v2, %v237_v1 }
  0x37   : > { %vm256_vm0 = vcmask 1041408   ;;  %p228_p7 = scmp.lt.s32.totalorder %s549_s12, 1  ;;  %vm267_vm1 = vcmask 0  }
  0x38   : > { %443 = vlog2.f32 %v240_v3 }
  0x39   : > { %445 = vlog2.f32 %v243_v4  ;;  %s718_s12 = smov (!%p228_p7, %s549_s12), 1 }
  0x3a   : > { %s230_s6 = scalar_lea.vmem %s705_s2, %s718_s12 }
  0x3d   : > { %v249_v11 = vld [vmem:[#allocation2] sm:$0x3] }
  0x45   : > { %v444_v5 = vpop.eup %443 }
  0x46   : > { %v446_v6 = vpop.eup %445  ;;  %v242_v7 = vmul.f32 0.6931472, %v444_v5 }
  0x47   : > { %v245_v9 = vmul.f32 0.6931472, %v446_v6 }
  0x49   : > { %v246_v10 = vsub.f32 %v242_v7, %v245_v9 }
  0x4b   : > { %v247_v12 = vmul.f32 %v246_v10, %v239_v8 }
  0x4d   : > { %v250_v13 = vadd.f32 %v249_v11, %v247_v12 }
  0x4f   : > { %251 = vst [vmem:[#allocation2] sm:$0x3] %v250_v13 }
  0x56   : > { %v255_v14 = vld [vmem:[#allocation2] sm:$0x3] }
  0x57   : > { %v257_v15 = vsel %vm256_vm0, %v255_v14, 0.0 }
  0x58   : > { %258 = vadd.xlane.f32.xlu0 %v257_v15 }
  0xe1   : > { %v259_v16 = vpop.xlane.xlu0 %258 }
  0xe2   : > { %v260_v17 = vrot.slane %v259_v16, 4 }
  0xe4   : > { %v261_v18 = vadd.f32 %v260_v17, %v259_v16 }
  0xe6   : > { %v262_v19 = vrot.slane %v261_v18, 2 }
  0xe8   : > { %v263_v20 = vadd.f32 %v262_v19, %v261_v18 }
  0xea   : > { %v264_v21 = vrot.slane %v263_v20, 1 }
  0xec   : > { %v265_v22 = vadd.f32 %v264_v21, %v263_v20 }
  0xee   : > { %v266_v23 = vmul.f32 0.001953125, %v265_v22 }
  0xf0   : > { %268 = vst.msk [vmem:[%s230_s6] sm:$0x1] %vm267_vm1, %v266_v23 }
  0xf1 PF: > { %s18_s14 = sadd.s32 1, %s557_s14   ;;  %s710_s9 = smov %s541_s10 }
  0xf2   : > { %p15_p9 = scmp.ge.s32.totalorder %s18_s14, 4   ;;  %s711_s10 = smov %s545_s11 }
  0xf3   : > { %s712_s11 = smov %s626_s21  ;;  %s713_s12 = smov %s553_s13 }
  0xf4   : > { %s714_s13 = smov %s716_s16  ;;  %17 = sbr.rel (!%p15_p9) target bundleno = 6 (0x6), region = 89 }
  0xf9   :  { %289 = vsyncpa [#allocation4], 1 }
  0xfa   :  { %291 = vsyncpa [#allocation4 + $0x1], 1 }
  0xfb   :  { %292 = vsyncpa [#allocation6], 1 }
  0xfc   :  { %294 = vsyncpa [#allocation6 + $0x1], 1 }

</bundles_post_ra>
